<compile_context>
chip_gen: v7x
topology: tpu7x:2x2x1
jax: 0.10.0
libtpu: 0.0.40
codegen_flags: <defaults>
</compile_context>

<pallas_src>
import functools
import math

import jax
import jax.numpy as jnp
from jax.experimental import pallas as pl
from jax.experimental.pallas import tpu as pltpu


def _round_up(x, m):
    return ((x + m - 1) // m) * m


# ---------------------------------------------------------------------------
# Chip detection / tile tables
# ---------------------------------------------------------------------------

# (tm_max, tn_max, tk_max) per generation -- sized so the double-buffered tile
# footprint sits comfortably under that generation's VMEM while reaching the
# MXU/HBM roofline (see perf review arithmetic).
_TILE_TABLE = {
    "v5e": (512, 512, 512),
    "v6e": (1536, 1536, 512),
    "v7x": (1024, 1024, 512),
    "unknown": (1024, 1024, 512),
}

_TILE_LADDER = (2048, 1792, 1536, 1280, 1024, 896, 768, 640, 512, 384, 256,
                128, 64, 32, 16)


def _chip_info():
    """Returns (generation string, usable VMEM capacity in bytes)."""
    kind = ""
    try:
        kind = jax.devices()[0].device_kind.lower()
    except Exception:
        pass
    if "v7" in kind:
        gen = "v7x"
    elif "v6" in kind:
        gen = "v6e"
    elif "v5" in kind:
        gen = "v5e"
    else:
        gen = "unknown"
    # Conservative default: 64 MiB covers every generation (v7x per-TC VMEM).
    cap = 128 * 1024 * 1024 if gen in ("v5e", "v6e") else 64 * 1024 * 1024
    try:
        queried = int(pltpu.get_tpu_info().vmem_capacity_bytes)
        if 16 * 1024 * 1024 <= queried <= 1024 * 1024 * 1024:
            cap = queried
    except Exception:
        pass
    return gen, cap


def _pick_tile(dim, align, max_tile):
    """Adaptive tile: full (aligned) dim if it fits one tile, else the largest
    ladder entry keeping padding waste <= 12.5%."""
    max_tile = max(align, (max_tile // align) * align)
    if dim <= max_tile:
        return _round_up(dim, align)
    candidates = [t for t in _TILE_LADDER
                  if t <= max_tile and t % align == 0] or [align]
    for t in candidates:  # descending -> prefer big tiles with low waste
        if (_round_up(dim, t) - dim) / dim <= 0.125:
            return t
    return min(candidates, key=lambda t: _round_up(dim, t))


# ---------------------------------------------------------------------------
# Kernels
# ---------------------------------------------------------------------------

def _linear_kernel_inplace(x_ref, w_ref, b_ref, o_ref, *, compute_dtype):
    """f32 output: accumulate directly into o_ref (no separate scratch)."""
    k = pl.program_id(2)

    @pl.when(k == 0)
    def _():
        o_ref[...] = jnp.zeros_like(o_ref)

    o_ref[...] += jnp.dot(x_ref[...].astype(compute_dtype), w_ref[...],
                          preferred_element_type=jnp.float32)

    @pl.when(k == pl.num_programs(2) - 1)
    def _():
        o_ref[...] += b_ref[...]


def _linear_kernel_acc(x_ref, w_ref, b_ref, o_ref, acc_ref, *, compute_dtype):
    """Narrow output dtype: f32 VMEM accumulator + cast-on-store epilogue."""
    k = pl.program_id(2)

    @pl.when(k == 0)
    def _():
        acc_ref[...] = jnp.zeros_like(acc_ref)

    acc_ref[...] += jnp.dot(x_ref[...].astype(compute_dtype), w_ref[...],
                            preferred_element_type=jnp.float32)

    @pl.when(k == pl.num_programs(2) - 1)
    def _():
        o_ref[...] = (acc_ref[...] + b_ref[...]).astype(o_ref.dtype)


# ---------------------------------------------------------------------------
# Wrapper
# ---------------------------------------------------------------------------

def linear_project(x, weight_kn, bias, *, compute_dtype=jnp.bfloat16,
                   tiles=None, force_kernel=False):
    """y = x @ weight_kn + bias  (== torch.nn.Linear with weight_kn = W.T).

    x:         (..., in_channels), any float dtype (output keeps x.dtype)
    weight_kn: (in_channels, out_channels) -- pre-transposed / pre-cast ONCE.
    bias:      (out_channels,)
    """
    K, N = weight_kn.shape
    assert x.shape[-1] == K, (x.shape, weight_kn.shape)
    lead = x.shape[:-1]
    M = int(math.prod(lead)) if lead else 1
    out_dtype = x.dtype

    x2 = x.reshape(M, K)
    bias2 = bias.astype(jnp.float32).reshape(1, N)

    # --- Small-problem fast path: a (1,1,1)-grid pallas_call is pure launch
    # overhead for sub-microsecond matmuls. -------------------------------
    if not force_kernel and tiles is None and M <= 512 and N <= 512 and K <= 512:
        y = jnp.dot(x2.astype(compute_dtype), weight_kn.astype(compute_dtype),
                    preferred_element_type=jnp.float32) + bias2
        return y.astype(out_dtype).reshape(*lead, N)

    gen, vmem_cap = _chip_info()
    tm_max, tn_max, tk_max = _TILE_TABLE[gen] if tiles is None else tiles

    tm = _pick_tile(M, 16, tm_max)    # sublane-aligned (covers bf16 packing)
    tn = _pick_tile(N, 128, tn_max)   # lane-dense output
    tk = _pick_tile(K, 128, tk_max)   # lane-dense x / sublane-aligned weight
    Mp, Np, Kp = _round_up(M, tm), _round_up(N, tn), _round_up(K, tk)
    grid = (Mp // tm, Np // tn, Kp // tk)

    # x handling: in-kernel bf16 cast is free; only pre-cast when x is
    # re-streamed over >2 N tiles (then the 6 B/elem pre-pass pays for itself).
    if grid[1] > 2 and x2.dtype != compute_dtype:
        x2 = x2.astype(compute_dtype)
    if (Mp, Kp) != (M, K):
        x2 = jnp.pad(x2, ((0, Mp - M), (0, Kp - K)))

    # Weight/bias: already laid out + cast at setup time; pad only if the
    # chosen tiles don't divide the true dims (rare with adaptive tiles).
    w2 = weight_kn if weight_kn.dtype == compute_dtype \
        else weight_kn.astype(compute_dtype)
    if (Kp, Np) != (K, N):
        w2 = jnp.pad(w2, ((0, Kp - K), (0, Np - N)))
    if Np != N:
        bias2 = jnp.pad(bias2, ((0, 0), (0, Np - N)))

    out_is_f32 = out_dtype == jnp.float32
    kernel = functools.partial(
        _linear_kernel_inplace if out_is_f32 else _linear_kernel_acc,
        compute_dtype=compute_dtype)
    scratch = [] if out_is_f32 else [pltpu.VMEM((tm, tn), jnp.float32)]

    x_bytes = x2.dtype.itemsize
    w_bytes = w2.dtype.itemsize
    out_bytes = jnp.dtype(out_dtype).itemsize
    footprint = (2 * (tm * tk * x_bytes + tk * tn * w_bytes)   # double-buffered in
                 + 2 * tn * 4                                  # bias tiles (f32)
                 + 2 * tm * tn * out_bytes                     # output tiles
                 + (0 if out_is_f32 else tm * tn * 4))         # acc scratch
    headroom = 8 * 1024 * 1024
    vmem_limit = int(min(max(32 * 1024 * 1024, footprint * 3 // 2),
                         max(vmem_cap - headroom, 16 * 1024 * 1024)))
    vmem_limit = max(vmem_limit, footprint + (2 << 20))

    cost = pl.CostEstimate(
        flops=2 * Mp * Np * Kp,
        transcendentals=0,
        bytes_accessed=(grid[1] * Mp * Kp * x_bytes      # x re-read per N tile
                        + grid[0] * Kp * Np * w_bytes    # w re-read per M tile
                        + Np * 4
                        + Mp * Np * out_bytes),
    )

    out = pl.pallas_call(
        kernel,
        out_shape=jax.ShapeDtypeStruct((Mp, Np), out_dtype),
        grid_spec=pltpu.PrefetchScalarGridSpec(
            num_scalar_prefetch=0,
            grid=grid,
            in_specs=[
                pl.BlockSpec((tm, tk), lambda i, j, k: (i, k)),
                pl.BlockSpec((tk, tn), lambda i, j, k: (k, j)),
                pl.BlockSpec((1, tn), lambda i, j, k: (0, j)),
            ],
            out_specs=pl.BlockSpec((tm, tn), lambda i, j, k: (i, j)),
            scratch_shapes=scratch,
        ),
        compiler_params=pltpu.CompilerParams(
            dimension_semantics=("parallel", "parallel", "arbitrary"),
            vmem_limit_bytes=vmem_limit,
        ),
        cost_estimate=cost,
    )(x2, w2, bias2)

    if (Mp, Np) != (M, N):
        out = out[:M, :N]
    return out.reshape(*lead, N)


class LinearProject:
    """JAX/Pallas equivalent of the PyTorch LinearProject module.

    Takes a torch-layout weight (out_channels, in_channels); the transpose to
    (in, out) and the bf16 cast happen ONCE here, not per forward call.
    """

    def __init__(self, weight, bias, compute_dtype=jnp.bfloat16):
        self.compute_dtype = compute_dtype
        self.weight_kn = jnp.asarray(weight).T.astype(compute_dtype)
        self.bias = jnp.asarray(bias, dtype=jnp.float32)

    def __call__(self, x, **kwargs):
        return linear_project(x, self.weight_kn, self.bias,
                              compute_dtype=self.compute_dtype, **kwargs)


if __name__ == "__main__":
    key = jax.random.PRNGKey(0)
    k_x, k_w, k_b, k_x2, k_w2, k_b2 = jax.random.split(key, 6)

    # --- Case 1: module-consistent small shape -------------------------------
    batch, seq = 2, 8
    in_channels, out_channels = 32, 64
    x = jax.random.normal(k_x, (batch, seq, in_channels), dtype=jnp.float32)

    bound = 1.0 / (in_channels ** 0.5)  # nn.Linear-style init
    weight = jax.random.uniform(k_w, (out_channels, in_channels),
                                dtype=jnp.float32, minval=-bound, maxval=bound)
    bias = jax.random.uniform(k_b, (out_channels,), dtype=jnp.float32,
                              minval=-bound, maxval=bound)

    proj = LinearProject(weight, bias)          # one-time transpose + bf16 cast

    y_kernel = proj(x, force_kernel=True)       # exercises the Pallas kernel
    jax.block_until_ready(y_kernel)
    y_fast = proj(x)                            # small-problem fast path
    y_ref = x @ weight.T + bias

    assert y_kernel.shape == (batch, seq, out_channels)
    assert y_kernel.dtype == x.dtype
    assert jnp.allclose(y_kernel, y_ref, atol=3e-2, rtol=3e-2), float(
        jnp.max(jnp.abs(y_kernel - y_ref)))
    assert jnp.allclose(y_fast, y_ref, atol=3e-2, rtol=3e-2)

    # --- Case 2: multi-tile grid (2 K steps, 2 N tiles), still small ----------
    in2, out2 = 256, 256
    x2 = jax.random.normal(k_x2, (batch, seq, in2), dtype=jnp.float32)
    bound2 = 1.0 / (in2 ** 0.5)
    w2 = jax.random.uniform(k_w2, (out2, in2), dtype=jnp.float32,
                            minval=-bound2, maxval=bound2)
    b2 = jax.random.uniform(k_b2, (out2,), dtype=jnp.float32,
                            minval=-bound2, maxval=bound2)
    proj2 = LinearProject(w2, b2)
    y2 = proj2(x2, force_kernel=True, tiles=(16, 128, 128))   # grid (1, 2, 2)
    jax.block_until_ready(y2)
    y2_ref = x2 @ w2.T + b2
    assert jnp.allclose(y2, y2_ref, atol=3e-2, rtol=3e-2), float(
        jnp.max(jnp.abs(y2 - y2_ref)))

    # --- Case 3: bf16 output -> accumulator-scratch epilogue path -------------
    y3 = proj2(x2.astype(jnp.bfloat16), force_kernel=True, tiles=(16, 128, 128))
    jax.block_until_ready(y3)
    assert y3.dtype == jnp.bfloat16
    assert jnp.allclose(y3.astype(jnp.float32), y2_ref, atol=1e-1, rtol=1e-1)

    print("KERNEL_OK")
</pallas_src>

<mosaic_0001>
module attributes {stable_mosaic.version = 11 : i64} {
  func.func @_linear_kernel_inplace(%arg0: i32, %arg1: i32, %arg2: i32, %arg3: memref<16x128xf32, #tpu.memory_space<vmem>>, %arg4: memref<128x128xbf16, #tpu.memory_space<vmem>>, %arg5: memref<1x128xf32, #tpu.memory_space<vmem>>, %arg6: memref<16x128xf32, #tpu.memory_space<vmem>>) attributes {dimension_semantics = [#tpu.dimension_semantics<parallel>, #tpu.dimension_semantics<parallel>, #tpu.dimension_semantics<arbitrary>], iteration_bounds = array<i64: 1, 1, 1>, scalar_prefetch = 0 : i64, scratch_operands = 0 : i64, tpu.core_type = #tpu.core_type<tc>, window_params = [{transform_indices = @transform_0, window_bounds = array<i64: 16, 128>}, {transform_indices = @transform_1, window_bounds = array<i64: 128, 128>}, {transform_indices = @transform_2, window_bounds = array<i64: 1, 128>}, {transform_indices = @transform_3, window_bounds = array<i64: 16, 128>}]} {
    %c0_i32 = arith.constant 0 : i32
    %0 = arith.cmpi eq, %arg2, %c0_i32 : i32
    %1 = arith.extui %0 : i1 to i32
    %c0_i32_0 = arith.constant 0 : i32
    %2 = arith.cmpi ne, %1, %c0_i32_0 : i32
    scf.if %2 {
      %cst_10 = arith.constant 0.000000e+00 : f32
      %13 = vector.broadcast %cst_10 : f32 to vector<16x128xf32>
      %c0_11 = arith.constant 0 : index
      %c0_12 = arith.constant 0 : index
      %14 = vector.load %arg6[%c0_11, %c0_12] : memref<16x128xf32, #tpu.memory_space<vmem>>, vector<16x128xf32>
      tpu.vector_store %arg6[%c0_11, %c0_12], %13 {strides = array<i32>} : memref<16x128xf32, #tpu.memory_space<vmem>>, vector<16x128xf32>,
    } else {
    }
    %c0 = arith.constant 0 : index
    %c0_1 = arith.constant 0 : index
    %3 = vector.load %arg6[%c0, %c0_1] : memref<16x128xf32, #tpu.memory_space<vmem>>, vector<16x128xf32>
    %c0_2 = arith.constant 0 : index
    %c0_3 = arith.constant 0 : index
    %4 = vector.load %arg3[%c0_2, %c0_3] : memref<16x128xf32, #tpu.memory_space<vmem>>, vector<16x128xf32>
    %5 = arith.truncf %4 : vector<16x128xf32> to vector<16x128xbf16>
    %c0_4 = arith.constant 0 : index
    %c0_5 = arith.constant 0 : index
    %6 = vector.load %arg4[%c0_4, %c0_5] : memref<128x128xbf16, #tpu.memory_space<vmem>>, vector<128x128xbf16>
    %cst = arith.constant dense<0.000000e+00> : vector<16x128xf32>
    %7 = tpu.matmul %5, %6, %cst {dimension_numbers = #tpu.dot_dimension_numbers<[1], [0], [0], [1], [0, 0, 1, 1], [], []>} : vector<16x128xbf16>, vector<128x128xbf16>, vector<16x128xf32> -> vector<16x128xf32>
    %8 = arith.addf %3, %7 : vector<16x128xf32>
    %c0_6 = arith.constant 0 : index
    %c0_7 = arith.constant 0 : index
    %9 = vector.load %arg6[%c0_6, %c0_7] : memref<16x128xf32, #tpu.memory_space<vmem>>, vector<16x128xf32>
    tpu.vector_store %arg6[%c0_6, %c0_7], %8 {strides = array<i32>} : memref<16x128xf32, #tpu.memory_space<vmem>>, vector<16x128xf32>,
    %c0_i32_8 = arith.constant 0 : i32
    %10 = arith.cmpi eq, %arg2, %c0_i32_8 : i32
    %11 = arith.extui %10 : i1 to i32
    %c0_i32_9 = arith.constant 0 : i32
    %12 = arith.cmpi ne, %11, %c0_i32_9 : i32
    scf.if %12 {
      %c0_10 = arith.constant 0 : index
      %c0_11 = arith.constant 0 : index
      %13 = vector.load %arg6[%c0_10, %c0_11] : memref<16x128xf32, #tpu.memory_space<vmem>>, vector<16x128xf32>
      %c0_12 = arith.constant 0 : index
      %c0_13 = arith.constant 0 : index
      %14 = vector.load %arg5[%c0_12, %c0_13] : memref<1x128xf32, #tpu.memory_space<vmem>>, vector<1x128xf32>
      %15 = vector.broadcast %14 : vector<1x128xf32> to vector<16x128xf32>
      %16 = arith.addf %13, %15 : vector<16x128xf32>
      %c0_14 = arith.constant 0 : index
      %c0_15 = arith.constant 0 : index
      %17 = vector.load %arg6[%c0_14, %c0_15] : memref<16x128xf32, #tpu.memory_space<vmem>>, vector<16x128xf32>
      tpu.vector_store %arg6[%c0_14, %c0_15], %16 {strides = array<i32>} : memref<16x128xf32, #tpu.memory_space<vmem>>, vector<16x128xf32>,
    } else {
    }
    return
  }
  func.func @transform_0(%arg0: i32, %arg1: i32, %arg2: i32) -> (i32, i32) {
    %c0_i32 = arith.constant 0 : i32
    return %arg0, %arg2 : i32, i32
  }
  func.func @transform_1(%arg0: i32, %arg1: i32, %arg2: i32) -> (i32, i32) {
    %c0_i32 = arith.constant 0 : i32
    return %arg2, %arg1 : i32, i32
  }
  func.func @transform_2(%arg0: i32, %arg1: i32, %arg2: i32) -> (i32, i32) {
    %c0_i32 = arith.constant 0 : i32
    %c0_i32_0 = arith.constant 0 : i32
    return %c0_i32, %arg1 : i32, i32
  }
  func.func @transform_3(%arg0: i32, %arg1: i32, %arg2: i32) -> (i32, i32) {
    %c0_i32 = arith.constant 0 : i32
    return %arg0, %arg1 : i32, i32
  }
}

</mosaic_0001>

<bundles_post_ra>
// kernel: tpu_custom_call.1
= control target key start
LH: loop header
LB: loop body
LE: loop exit
PB: predicated region body
PF: predicated region fallthrough
CT: control target
= control target key end

     0   :  { %8 = vsyncpa [#allocation3], 0  ;;  %s399_s0 = inlined_call_operand.hbm [shape: f32[16,128], index: 0, kind: input, shape index: {}]   ;;  %s400_s1 = inlined_call_operand.hbm [shape: bf16[128,128], index: 1, kind: input, shape index: {}]   ;;  %s401_s2 = inlined_call_operand.vmem [shape: f32[1,128], index: 2, kind: input, shape index: {}]   ;;  %s402_s3 = inlined_call_operand.hbm [shape: f32[16,128], index: 3, kind: output, shape index: {}]  }
   0x1   :  { %9 = vsyncpa [#allocation6], 0 }
   0x2   :  { %10 = vsyncpa [#allocation4], 0  ;;  %s325_s12 = smov [#allocation2]   ;;  %s253_s16 = scalar_lea.hbm %s399_s0, 256 }
   0x3   :  { %s16_s13 = sshll.u32 %s325_s12, 4  ;;  %p254_p0 = scmp.ne.s32.totalorder %s399_s0, %s253_s16  ;;  %s17_s13 = int_to_ptr.vmem [resolvable:$true] %s16_s13 }
   0x4   :  { %p257_p1 = scmp.lt.u32.totalorder %s253_s16, %s399_s0 }
   0x6   :  { %p259_p2 = pnand %p257_p1, %p254_p0 }
   0x8   :  { %262 = shalt.err (!%p259_p2)
}
   0x9   :  { %s263_s21 = scalar_lea.vmem %s17_s13, 256  ;;  %p268_p4 = scmp.lt.s32.totalorder %s17_s13, %s17_s13 }
   0xa   :  { %p264_p3 = scmp.ne.s32.totalorder %s17_s13, %s263_s21  ;;  %p269_p5 = scmp.lt.s32.totalorder %s263_s21, %s263_s21 }
   0xc   :  { %p270_p6 = por %p269_p5, %p268_p4 }
   0xe   :  { %p271_p7 = pnand %p270_p6, %p264_p3 }
  0x10   :  { %274 = shalt.err (!%p271_p7)
}
  0x11   :  { %s326_s22 = smov 128   ;;  %s327_s23 = smov 8  }
  0x12   :  { %22 = dma.hbm_to_vmem [thread:$0]  %s399_s0, 256, %s17_s13, [#allocation3], %s326_s22, %s326_s22, %s327_s23  }
  0x13   :  { %s328_s26 = smov [#allocation5]   ;;  %s275_s30 = scalar_lea.hbm %s400_s1, 1024 }
  0x14   :  { %s28_s27 = sshll.u32 %s328_s26, 4  ;;  %p276_p8 = scmp.ne.s32.totalorder %s400_s1, %s275_s30  ;;  %s29_s27 = int_to_ptr.vmem [resolvable:$true] %s28_s27 }
  0x15   :  { %p279_p9 = scmp.lt.u32.totalorder %s275_s30, %s400_s1 }
  0x17   :  { %p281_p10 = pnand %p279_p9, %p276_p8 }
  0x19   :  { %284 = shalt.err (!%p281_p10)
}
  0x1a   :  { %s285_s8 = scalar_lea.vmem %s29_s27, 1024  ;;  %p290_p12 = scmp.lt.s32.totalorder %s29_s27, %s29_s27 }
  0x1b   :  { %p286_p11 = scmp.ne.s32.totalorder %s29_s27, %s285_s8  ;;  %p291_p13 = scmp.lt.s32.totalorder %s285_s8, %s285_s8 }
  0x1d   :  { %p292_p0 = por %p291_p13, %p290_p12 }
  0x1f   :  { %p293_p1 = pnand %p292_p0, %p286_p11 }
  0x21   :  { %296 = shalt.err (!%p293_p1)
}
  0x22   :  { %s329_s0 = smov 64   ;;  %s330_s9 = smov 4  }
  0x23   :  { %34 = dma.hbm_to_vmem [thread:$0]  %s400_s1, 1024, %s29_s27, [#allocation6], %s329_s0, %s329_s0, %s330_s9  }
  0x24   :  { %319 = dma.done.wait [#allocation3], 256  }
  0x25   :  { %320 = vsyncadd [#allocation3], 4294967040 }
  0x26   :  { %321 = dma.done.wait [#allocation6], 1024  }
  0x27   :  { %322 = vsyncadd [#allocation6], 4294966272  ;;  %v331_v0 = vmov 0.0   ;;  %vm332_vm0 = vmmov 0   ;;  %v245_v1 = vld [vmem:[#allocation5] sm:$0xff]   ;;  %v246_v2 = vld [vmem:[#allocation5 + $0x8] sm:$0xff]  }
  0x28   :  { %216 = vmatprep.subr.bf16.mxu0 %v331_v0  ;;  %232 = vmatprep.mubr.msk.bf16.mxu0 %vm332_vm0, %v331_v0  ;;  %v247_v3 = vld [vmem:[#allocation5 + $0x10] sm:$0xff]   ;;  %v248_v4 = vld [vmem:[#allocation5 + $0x18] sm:$0xff]   ;;  %v249_v5 = vld [vmem:[#allocation5 + $0x20] sm:$0xff]   ;;  %s333_s13 = smov [#allocation7]  }
  0x29   :  { %217 = vmatpush3.bf16.msra.mxu0 %v245_v1  ;;  %v250_v6 = vld [vmem:[#allocation5 + $0x28] sm:$0xff]   ;;  %v251_v7 = vld [vmem:[#allocation5 + $0x30] sm:$0xff]   ;;  %v252_v8 = vld [vmem:[#allocation5 + $0x38] sm:$0xff]   ;;  %s185_s14 = sshll.u32 %s333_s13, 4  ;;  %s186_s14 = int_to_ptr.vmem [resolvable:$true] %s185_s14 }
  0x2a   :  { %218 = vmatprep.subr.bf16.mxu0 %v331_v0  ;;  %v52_v9 = vld [vmem:[#allocation2] sm:$0xff]  ;;  %v53_v10 = vld [vmem:[#allocation2 + $0x8] sm:$0xff]  ;;  %s297_s15 = scalar_lea.vmem %s186_s14, 256  ;;  %p302_p3 = scmp.lt.s32.totalorder %s186_s14, %s186_s14 }
  0x2b   :  { %v54_v11 = vpack.c.bf16 %v53_v10, %v52_v9  ;;  %v206_v13 = vld [vmem:[%s401_s2] ss:$0 sm:$0xff]  ;;  %p298_p2 = scmp.ne.s32.totalorder %s186_s14, %s297_s15  ;;  %p303_p4 = scmp.lt.s32.totalorder %s297_s15, %s297_s15 }
  0x2d   :  { %219 = vmatpush3.bf16.msra.mxu0 %v246_v2  ;;  %p304_p5 = por %p303_p4, %p302_p3 }
  0x2e   :  { %220 = vmatprep.subr.bf16.mxu0 %v331_v0 }
  0x2f   :  { %p305_p6 = pnand %p304_p5, %p298_p2 }
  0x31   :  { %221 = vmatpush3.bf16.msra.mxu0 %v247_v3 }
  0x32   :  { %222 = vmatprep.subr.bf16.mxu0 %v331_v0 }
  0x35   :  { %223 = vmatpush3.bf16.msra.mxu0 %v248_v4 }
  0x36   :  { %224 = vmatprep.subr.bf16.mxu0 %v331_v0 }
  0x39   :  { %225 = vmatpush3.bf16.msra.mxu0 %v249_v5 }
  0x3a   :  { %226 = vmatprep.subr.bf16.mxu0 %v331_v0 }
  0x3d   :  { %227 = vmatpush3.bf16.msra.mxu0 %v250_v6 }
  0x3e   :  { %228 = vmatprep.subr.bf16.mxu0 %v331_v0 }
  0x41   :  { %229 = vmatpush3.bf16.msra.mxu0 %v251_v7 }
  0x42   :  { %230 = vmatprep.subr.bf16.mxu0 %v331_v0 }
  0x45   :  { %231 = vmatpush3.bf16.msra.mxu0 %v252_v8 }
  0x48   :  { %233 = vmatmul.mubr.bf16.vlgmr.msra.gmra.mrb[0].mxu0 %v54_v11 }
 0x11b   :  { %v153_v12 = vpop.f32.mrb[0].mxu0 }
 0x11c   :  { %v234_v14 = vpop.f32.mrb[1].mxu0  ;;  %v176_v17 = vadd.f32 %v206_v13, %v153_v12 }
 0x11d   :  { %v156_v15 = vpop.f32.mrb[2].mxu0 }
 0x11e   :  { %v235_v16 = vpop.f32.mrb[3].mxu0  ;;  %v177_v18 = vadd.f32 %v206_v13, %v156_v15  ;;  %178 = vst [vmem:[#allocation7] sm:$0xff] %v176_v17 }
 0x120   :  { %179 = vst [vmem:[#allocation7 + $0x8] sm:$0xff] %v177_v18 }
 0x121   :  { %308 = shalt.err (!%p305_p6)
}
 0x122   :  { %s309_s2 = scalar_lea.hbm %s402_s3, 256 }
 0x123   :  { %p310_p7 = scmp.ne.s32.totalorder %s402_s3, %s309_s2  ;;  %p313_p8 = scmp.lt.u32.totalorder %s309_s2, %s402_s3 }
 0x125   :  { %p315_p9 = pnand %p313_p8, %p310_p7 }
 0x127   :  { %318 = shalt.err (!%p315_p9)
}
 0x128   :  { %191 = dma.vmem_to_hbm [thread:$0]  %s186_s14, 256, %s402_s3, [#allocation4], %s326_s22, %s326_s22, %s327_s23  }
 0x129   :  { %323 = dma.done.wait [#allocation4], 256  }
 0x12a   :  { %324 = vsyncadd [#allocation4], 4294967040 }
 0x12b   :  { %195 = vsyncpa [#allocation3], 1 }
 0x12c   :  { %196 = vsyncpa [#allocation6], 1 }
 0x12d   :  { %197 = vsyncpa [#allocation4], 1 }

</bundles_post_ra>
